<compile_context>
chip_gen: v6e
topology: v6e:2x2x1
jax: 0.10.0
libtpu: 0.0.40
codegen_flags: <defaults>
</compile_context>

<pallas_src>
import jax
import jax.numpy as jnp
from jax.experimental import pallas as pl
from jax.experimental.pallas import tpu as pltpu

_TB_MIN = 1024            # minimum tile: multiple of 1024 lanes
_TB_MAX = 65536           # cap so double-buffered tiles fit v7x's 64 MiB VMEM
_VMEM_LIMIT_BYTES = 48 << 20   # > v5e's 16 MiB default, < v7x's 64 MiB physical
_PALLAS_MIN_BATCH = 131072     # below this the fused-XLA path (no transpose
                               # passes, no launch overhead) wins end-to-end


def _dense_relu(w_ref, b_ref, x):
    """relu(W @ x + b) via unrolled VPU broadcast-FMAs.

    w_ref: (d_out, d_in) weights, b_ref: (d_out, 1) bias, x: (d_in, TB).
    Returns (d_out, TB).  d_in <= 8, so a static Python unroll is ideal; the
    bias is folded into the first term.
    """
    d_in = w_ref.shape[1]
    w = w_ref[...]
    acc = w[:, 0:1] * x[0:1, :] + b_ref[...]
    for k in range(1, d_in):
        acc = acc + w[:, k:k + 1] * x[k:k + 1, :]
    return jnp.maximum(acc, 0.0)


def _mlp3_kernel(x_ref, w1_ref, b1_ref, w2_ref, b2_ref, w3_ref, b3_ref, o_ref):
    # Feature-major: x_ref is (5, TB); weights (d_out, d_in); biases (d_out, 1).
    x = x_ref[...]
    h = _dense_relu(w1_ref, b1_ref, x)    # net1: Linear(5 -> 8) + ReLU
    h = _dense_relu(w2_ref, b2_ref, h)    # remote SimpleNet: Linear(8 -> 5) + ReLU
    h = _dense_relu(w3_ref, b3_ref, h)    # net2: Linear(5 -> 3) + ReLU
    o_ref[...] = h.astype(o_ref.dtype)


def _choose_tile(B):
    """Tile of batch columns: ~B/2 (even tile count for v7x's two TCs),
    rounded up to a multiple of 1024 lanes, clamped to [1024, 65536]."""
    tb = (pl.cdiv(B, 2) + _TB_MIN - 1) // _TB_MIN * _TB_MIN
    return max(_TB_MIN, min(tb, _TB_MAX))


def ddp_model_with_rpc_forward_fm(x_t, params):
    """Feature-major Pallas forward: x_t (5, B) float32 -> (3, B) float32.

    No wrapper transposes, no padding passes: ragged last block handled by
    Pallas write masking (columns are independent inside the kernel)."""
    w1, b1 = params["w1"], params["b1"]   # (8, 5), (8, 1)
    w2, b2 = params["w2"], params["b2"]   # (5, 8), (5, 1)
    w3, b3 = params["w3"], params["b3"]   # (3, 5), (3, 1)
    d_in = w1.shape[1]
    d_out = w3.shape[0]
    B = x_t.shape[1]

    tb = _choose_tile(B)
    n_tiles = pl.cdiv(B, tb)

    const = lambda arr: pl.BlockSpec(arr.shape, lambda i: (0, 0))

    return pl.pallas_call(
        _mlp3_kernel,
        out_shape=jax.ShapeDtypeStruct((d_out, B), jnp.float32),
        grid=(n_tiles,),
        in_specs=[
            pl.BlockSpec((d_in, tb), lambda i: (0, i)),   # x tile walks batch
            const(w1), const(b1),                         # tiny weights stay resident
            const(w2), const(b2),
            const(w3), const(b3),
        ],
        out_specs=pl.BlockSpec((d_out, tb), lambda i: (0, i)),
        compiler_params=pltpu.CompilerParams(
            dimension_semantics=("parallel",),            # megacore split on v7x
            vmem_limit_bytes=_VMEM_LIMIT_BYTES),
    )(x_t, w1, b1, w2, b2, w3, b3)


def _fused_reference(x, p):
    """Plain fused jnp forward (also the small/mid-batch fast path)."""
    h = jnp.maximum(x @ p["w1"].T + p["b1"].T, 0.0)
    h = jnp.maximum(h @ p["w2"].T + p["b2"].T, 0.0)
    return jnp.maximum(h @ p["w3"].T + p["b3"].T, 0.0)


def ddp_model_with_rpc_forward(x, params, *, use_pallas=None):
    """Batch-major PyTorch interface: x (B, 5) float32 -> (B, 3) float32."""
    B = x.shape[0]
    if use_pallas is None:
        # The x.T / .T wrapper transposes are extra XLA HBM passes; the Pallas
        # path only wins once they are amortized over a very large batch.
        use_pallas = B >= _PALLAS_MIN_BATCH
    if not use_pallas:
        return _fused_reference(x, params)
    return ddp_model_with_rpc_forward_fm(x.T, params).T


def init_params(key):
    """Deterministic init mirroring nn.Linear defaults: U(-1/sqrt(fan_in), +)."""
    def linear(key, d_in, d_out):
        kw, kb = jax.random.split(key)
        bound = 1.0 / jnp.sqrt(jnp.float32(d_in))
        # PyTorch layout: weight (d_out, d_in); bias kept 2D (d_out, 1).
        w = jax.random.uniform(kw, (d_out, d_in), jnp.float32, -bound, bound)
        b = jax.random.uniform(kb, (d_out, 1), jnp.float32, -bound, bound)
        return w, b

    k1, k2, k3 = jax.random.split(key, 3)
    w1, b1 = linear(k1, 5, 8)   # net1: SimpleNet(5, 8)
    w2, b2 = linear(k2, 8, 5)   # remote: SimpleNet(8, 5)
    w3, b3 = linear(k3, 5, 3)   # net2: SimpleNet(5, 3)
    return {"w1": w1, "b1": b1, "w2": w2, "b2": b2, "w3": w3, "b3": b3}


if __name__ == "__main__":
    key = jax.random.PRNGKey(0)
    kx, kp = jax.random.split(key)

    # Small batch, but big enough to exercise batch tiling (2 grid steps with
    # tb = 1024) AND the ragged last block (1536 % 1024 != 0).
    B = 1536
    x = jax.random.normal(kx, (B, 5), dtype=jnp.float32)
    params = init_params(kp)
    ref = _fused_reference(x, params)

    # Pallas path via the batch-major wrapper (forced; B is below the
    # auto-bypass threshold).
    out = jax.block_until_ready(
        ddp_model_with_rpc_forward(x, params, use_pallas=True))
    assert out.shape == (B, 3), out.shape
    assert jnp.allclose(out, ref, atol=1e-5, rtol=1e-5), "pallas path mismatch"

    # Feature-major (transpose-free) entry point.
    out_fm = jax.block_until_ready(ddp_model_with_rpc_forward_fm(x.T, params))
    assert out_fm.shape == (3, B), out_fm.shape
    assert jnp.allclose(out_fm.T, ref, atol=1e-5, rtol=1e-5), "fm path mismatch"

    # Small-batch bypass path (auto-selected for B=8).
    out_small = jax.block_until_ready(
        ddp_model_with_rpc_forward(x[:8], params))
    assert out_small.shape == (8, 3), out_small.shape
    assert jnp.allclose(out_small, ref[:8], atol=1e-5, rtol=1e-5), "bypass mismatch"

    print("KERNEL_OK")
</pallas_src>

<mosaic_0001>
module attributes {stable_mosaic.version = 11 : i64} {
  func.func @_mlp3_kernel(%arg0: i32, %arg1: memref<5x1024xf32, #tpu.memory_space<vmem>>, %arg2: memref<8x5xf32, #tpu.memory_space<vmem>>, %arg3: memref<8x1xf32, #tpu.memory_space<vmem>>, %arg4: memref<5x8xf32, #tpu.memory_space<vmem>>, %arg5: memref<5x1xf32, #tpu.memory_space<vmem>>, %arg6: memref<3x5xf32, #tpu.memory_space<vmem>>, %arg7: memref<3x1xf32, #tpu.memory_space<vmem>>, %arg8: memref<3x1024xf32, #tpu.memory_space<vmem>>) attributes {dimension_semantics = [#tpu.dimension_semantics<parallel>], iteration_bounds = array<i64: 2>, scalar_prefetch = 0 : i64, scratch_operands = 0 : i64, tpu.core_type = #tpu.core_type<tc>, window_params = [{transform_indices = @transform_0, window_bounds = array<i64: 5, 1024>}, {pipeline_mode = #tpu.pipeline_mode<synchronous>, transform_indices = @transform_1, window_bounds = array<i64: 8, 5>}, {pipeline_mode = #tpu.pipeline_mode<synchronous>, transform_indices = @transform_2, window_bounds = array<i64: 8, 1>}, {pipeline_mode = #tpu.pipeline_mode<synchronous>, transform_indices = @transform_3, window_bounds = array<i64: 5, 8>}, {pipeline_mode = #tpu.pipeline_mode<synchronous>, transform_indices = @transform_4, window_bounds = array<i64: 5, 1>}, {pipeline_mode = #tpu.pipeline_mode<synchronous>, transform_indices = @transform_5, window_bounds = array<i64: 3, 5>}, {pipeline_mode = #tpu.pipeline_mode<synchronous>, transform_indices = @transform_6, window_bounds = array<i64: 3, 1>}, {transform_indices = @transform_7, window_bounds = array<i64: 3, 1024>}]} {
    %c0 = arith.constant 0 : index
    %c0_0 = arith.constant 0 : index
    %0 = vector.load %arg1[%c0, %c0_0] : memref<5x1024xf32, #tpu.memory_space<vmem>>, vector<5x1024xf32>
    %c0_1 = arith.constant 0 : index
    %c0_2 = arith.constant 0 : index
    %1 = vector.load %arg2[%c0_1, %c0_2] : memref<8x5xf32, #tpu.memory_space<vmem>>, vector<8x5xf32>
    %2 = vector.extract_strided_slice %1 {offsets = [0, 0], sizes = [8, 1], strides = [1, 1]} : vector<8x5xf32> to vector<8x1xf32>
    %3 = vector.extract_strided_slice %0 {offsets = [0, 0], sizes = [1, 1024], strides = [1, 1]} : vector<5x1024xf32> to vector<1x1024xf32>
    %4 = vector.broadcast %2 : vector<8x1xf32> to vector<8x1024xf32>
    %5 = vector.broadcast %3 : vector<1x1024xf32> to vector<8x1024xf32>
    %6 = arith.mulf %4, %5 : vector<8x1024xf32>
    %c0_3 = arith.constant 0 : index
    %c0_4 = arith.constant 0 : index
    %7 = vector.load %arg3[%c0_3, %c0_4] : memref<8x1xf32, #tpu.memory_space<vmem>>, vector<8x1xf32>
    %8 = vector.broadcast %7 : vector<8x1xf32> to vector<8x1024xf32>
    %9 = arith.addf %6, %8 : vector<8x1024xf32>
    %10 = vector.extract_strided_slice %1 {offsets = [0, 1], sizes = [8, 1], strides = [1, 1]} : vector<8x5xf32> to vector<8x1xf32>
    %11 = vector.extract_strided_slice %0 {offsets = [1, 0], sizes = [1, 1024], strides = [1, 1]} : vector<5x1024xf32> to vector<1x1024xf32>
    %12 = vector.broadcast %10 : vector<8x1xf32> to vector<8x1024xf32>
    %13 = vector.broadcast %11 : vector<1x1024xf32> to vector<8x1024xf32>
    %14 = arith.mulf %12, %13 : vector<8x1024xf32>
    %15 = arith.addf %9, %14 : vector<8x1024xf32>
    %16 = vector.extract_strided_slice %1 {offsets = [0, 2], sizes = [8, 1], strides = [1, 1]} : vector<8x5xf32> to vector<8x1xf32>
    %17 = vector.extract_strided_slice %0 {offsets = [2, 0], sizes = [1, 1024], strides = [1, 1]} : vector<5x1024xf32> to vector<1x1024xf32>
    %18 = vector.broadcast %16 : vector<8x1xf32> to vector<8x1024xf32>
    %19 = vector.broadcast %17 : vector<1x1024xf32> to vector<8x1024xf32>
    %20 = arith.mulf %18, %19 : vector<8x1024xf32>
    %21 = arith.addf %15, %20 : vector<8x1024xf32>
    %22 = vector.extract_strided_slice %1 {offsets = [0, 3], sizes = [8, 1], strides = [1, 1]} : vector<8x5xf32> to vector<8x1xf32>
    %23 = vector.extract_strided_slice %0 {offsets = [3, 0], sizes = [1, 1024], strides = [1, 1]} : vector<5x1024xf32> to vector<1x1024xf32>
    %24 = vector.broadcast %22 : vector<8x1xf32> to vector<8x1024xf32>
    %25 = vector.broadcast %23 : vector<1x1024xf32> to vector<8x1024xf32>
    %26 = arith.mulf %24, %25 : vector<8x1024xf32>
    %27 = arith.addf %21, %26 : vector<8x1024xf32>
    %28 = vector.extract_strided_slice %1 {offsets = [0, 4], sizes = [8, 1], strides = [1, 1]} : vector<8x5xf32> to vector<8x1xf32>
    %29 = vector.extract_strided_slice %0 {offsets = [4, 0], sizes = [1, 1024], strides = [1, 1]} : vector<5x1024xf32> to vector<1x1024xf32>
    %30 = vector.broadcast %28 : vector<8x1xf32> to vector<8x1024xf32>
    %31 = vector.broadcast %29 : vector<1x1024xf32> to vector<8x1024xf32>
    %32 = arith.mulf %30, %31 : vector<8x1024xf32>
    %33 = arith.addf %27, %32 : vector<8x1024xf32>
    %cst = arith.constant 0.000000e+00 : f32
    %34 = vector.broadcast %cst : f32 to vector<8x1024xf32>
    %35 = arith.maximumf %33, %34 : vector<8x1024xf32>
    %c0_5 = arith.constant 0 : index
    %c0_6 = arith.constant 0 : index
    %36 = vector.load %arg4[%c0_5, %c0_6] : memref<5x8xf32, #tpu.memory_space<vmem>>, vector<5x8xf32>
    %37 = vector.extract_strided_slice %36 {offsets = [0, 0], sizes = [5, 1], strides = [1, 1]} : vector<5x8xf32> to vector<5x1xf32>
    %38 = vector.extract_strided_slice %35 {offsets = [0, 0], sizes = [1, 1024], strides = [1, 1]} : vector<8x1024xf32> to vector<1x1024xf32>
    %39 = vector.broadcast %37 : vector<5x1xf32> to vector<5x1024xf32>
    %40 = vector.broadcast %38 : vector<1x1024xf32> to vector<5x1024xf32>
    %41 = arith.mulf %39, %40 : vector<5x1024xf32>
    %c0_7 = arith.constant 0 : index
    %c0_8 = arith.constant 0 : index
    %42 = vector.load %arg5[%c0_7, %c0_8] : memref<5x1xf32, #tpu.memory_space<vmem>>, vector<5x1xf32>
    %43 = vector.broadcast %42 : vector<5x1xf32> to vector<5x1024xf32>
    %44 = arith.addf %41, %43 : vector<5x1024xf32>
    %45 = vector.extract_strided_slice %36 {offsets = [0, 1], sizes = [5, 1], strides = [1, 1]} : vector<5x8xf32> to vector<5x1xf32>
    %46 = vector.extract_strided_slice %35 {offsets = [1, 0], sizes = [1, 1024], strides = [1, 1]} : vector<8x1024xf32> to vector<1x1024xf32>
    %47 = vector.broadcast %45 : vector<5x1xf32> to vector<5x1024xf32>
    %48 = vector.broadcast %46 : vector<1x1024xf32> to vector<5x1024xf32>
    %49 = arith.mulf %47, %48 : vector<5x1024xf32>
    %50 = arith.addf %44, %49 : vector<5x1024xf32>
    %51 = vector.extract_strided_slice %36 {offsets = [0, 2], sizes = [5, 1], strides = [1, 1]} : vector<5x8xf32> to vector<5x1xf32>
    %52 = vector.extract_strided_slice %35 {offsets = [2, 0], sizes = [1, 1024], strides = [1, 1]} : vector<8x1024xf32> to vector<1x1024xf32>
    %53 = vector.broadcast %51 : vector<5x1xf32> to vector<5x1024xf32>
    %54 = vector.broadcast %52 : vector<1x1024xf32> to vector<5x1024xf32>
    %55 = arith.mulf %53, %54 : vector<5x1024xf32>
    %56 = arith.addf %50, %55 : vector<5x1024xf32>
    %57 = vector.extract_strided_slice %36 {offsets = [0, 3], sizes = [5, 1], strides = [1, 1]} : vector<5x8xf32> to vector<5x1xf32>
    %58 = vector.extract_strided_slice %35 {offsets = [3, 0], sizes = [1, 1024], strides = [1, 1]} : vector<8x1024xf32> to vector<1x1024xf32>
    %59 = vector.broadcast %57 : vector<5x1xf32> to vector<5x1024xf32>
    %60 = vector.broadcast %58 : vector<1x1024xf32> to vector<5x1024xf32>
    %61 = arith.mulf %59, %60 : vector<5x1024xf32>
    %62 = arith.addf %56, %61 : vector<5x1024xf32>
    %63 = vector.extract_strided_slice %36 {offsets = [0, 4], sizes = [5, 1], strides = [1, 1]} : vector<5x8xf32> to vector<5x1xf32>
    %64 = vector.extract_strided_slice %35 {offsets = [4, 0], sizes = [1, 1024], strides = [1, 1]} : vector<8x1024xf32> to vector<1x1024xf32>
    %65 = vector.broadcast %63 : vector<5x1xf32> to vector<5x1024xf32>
    %66 = vector.broadcast %64 : vector<1x1024xf32> to vector<5x1024xf32>
    %67 = arith.mulf %65, %66 : vector<5x1024xf32>
    %68 = arith.addf %62, %67 : vector<5x1024xf32>
    %69 = vector.extract_strided_slice %36 {offsets = [0, 5], sizes = [5, 1], strides = [1, 1]} : vector<5x8xf32> to vector<5x1xf32>
    %70 = vector.extract_strided_slice %35 {offsets = [5, 0], sizes = [1, 1024], strides = [1, 1]} : vector<8x1024xf32> to vector<1x1024xf32>
    %71 = vector.broadcast %69 : vector<5x1xf32> to vector<5x1024xf32>
    %72 = vector.broadcast %70 : vector<1x1024xf32> to vector<5x1024xf32>
    %73 = arith.mulf %71, %72 : vector<5x1024xf32>
    %74 = arith.addf %68, %73 : vector<5x1024xf32>
    %75 = vector.extract_strided_slice %36 {offsets = [0, 6], sizes = [5, 1], strides = [1, 1]} : vector<5x8xf32> to vector<5x1xf32>
    %76 = vector.extract_strided_slice %35 {offsets = [6, 0], sizes = [1, 1024], strides = [1, 1]} : vector<8x1024xf32> to vector<1x1024xf32>
    %77 = vector.broadcast %75 : vector<5x1xf32> to vector<5x1024xf32>
    %78 = vector.broadcast %76 : vector<1x1024xf32> to vector<5x1024xf32>
    %79 = arith.mulf %77, %78 : vector<5x1024xf32>
    %80 = arith.addf %74, %79 : vector<5x1024xf32>
    %81 = vector.extract_strided_slice %36 {offsets = [0, 7], sizes = [5, 1], strides = [1, 1]} : vector<5x8xf32> to vector<5x1xf32>
    %82 = vector.extract_strided_slice %35 {offsets = [7, 0], sizes = [1, 1024], strides = [1, 1]} : vector<8x1024xf32> to vector<1x1024xf32>
    %83 = vector.broadcast %81 : vector<5x1xf32> to vector<5x1024xf32>
    %84 = vector.broadcast %82 : vector<1x1024xf32> to vector<5x1024xf32>
    %85 = arith.mulf %83, %84 : vector<5x1024xf32>
    %86 = arith.addf %80, %85 : vector<5x1024xf32>
    %cst_9 = arith.constant 0.000000e+00 : f32
    %87 = vector.broadcast %cst_9 : f32 to vector<5x1024xf32>
    %88 = arith.maximumf %86, %87 : vector<5x1024xf32>
    %c0_10 = arith.constant 0 : index
    %c0_11 = arith.constant 0 : index
    %89 = vector.load %arg6[%c0_10, %c0_11] : memref<3x5xf32, #tpu.memory_space<vmem>>, vector<3x5xf32>
    %90 = vector.extract_strided_slice %89 {offsets = [0, 0], sizes = [3, 1], strides = [1, 1]} : vector<3x5xf32> to vector<3x1xf32>
    %91 = vector.extract_strided_slice %88 {offsets = [0, 0], sizes = [1, 1024], strides = [1, 1]} : vector<5x1024xf32> to vector<1x1024xf32>
    %92 = vector.broadcast %90 : vector<3x1xf32> to vector<3x1024xf32>
    %93 = vector.broadcast %91 : vector<1x1024xf32> to vector<3x1024xf32>
    %94 = arith.mulf %92, %93 : vector<3x1024xf32>
    %c0_12 = arith.constant 0 : index
    %c0_13 = arith.constant 0 : index
    %95 = vector.load %arg7[%c0_12, %c0_13] : memref<3x1xf32, #tpu.memory_space<vmem>>, vector<3x1xf32>
    %96 = vector.broadcast %95 : vector<3x1xf32> to vector<3x1024xf32>
    %97 = arith.addf %94, %96 : vector<3x1024xf32>
    %98 = vector.extract_strided_slice %89 {offsets = [0, 1], sizes = [3, 1], strides = [1, 1]} : vector<3x5xf32> to vector<3x1xf32>
    %99 = vector.extract_strided_slice %88 {offsets = [1, 0], sizes = [1, 1024], strides = [1, 1]} : vector<5x1024xf32> to vector<1x1024xf32>
    %100 = vector.broadcast %98 : vector<3x1xf32> to vector<3x1024xf32>
    %101 = vector.broadcast %99 : vector<1x1024xf32> to vector<3x1024xf32>
    %102 = arith.mulf %100, %101 : vector<3x1024xf32>
    %103 = arith.addf %97, %102 : vector<3x1024xf32>
    %104 = vector.extract_strided_slice %89 {offsets = [0, 2], sizes = [3, 1], strides = [1, 1]} : vector<3x5xf32> to vector<3x1xf32>
    %105 = vector.extract_strided_slice %88 {offsets = [2, 0], sizes = [1, 1024], strides = [1, 1]} : vector<5x1024xf32> to vector<1x1024xf32>
    %106 = vector.broadcast %104 : vector<3x1xf32> to vector<3x1024xf32>
    %107 = vector.broadcast %105 : vector<1x1024xf32> to vector<3x1024xf32>
    %108 = arith.mulf %106, %107 : vector<3x1024xf32>
    %109 = arith.addf %103, %108 : vector<3x1024xf32>
    %110 = vector.extract_strided_slice %89 {offsets = [0, 3], sizes = [3, 1], strides = [1, 1]} : vector<3x5xf32> to vector<3x1xf32>
    %111 = vector.extract_strided_slice %88 {offsets = [3, 0], sizes = [1, 1024], strides = [1, 1]} : vector<5x1024xf32> to vector<1x1024xf32>
    %112 = vector.broadcast %110 : vector<3x1xf32> to vector<3x1024xf32>
    %113 = vector.broadcast %111 : vector<1x1024xf32> to vector<3x1024xf32>
    %114 = arith.mulf %112, %113 : vector<3x1024xf32>
    %115 = arith.addf %109, %114 : vector<3x1024xf32>
    %116 = vector.extract_strided_slice %89 {offsets = [0, 4], sizes = [3, 1], strides = [1, 1]} : vector<3x5xf32> to vector<3x1xf32>
    %117 = vector.extract_strided_slice %88 {offsets = [4, 0], sizes = [1, 1024], strides = [1, 1]} : vector<5x1024xf32> to vector<1x1024xf32>
    %118 = vector.broadcast %116 : vector<3x1xf32> to vector<3x1024xf32>
    %119 = vector.broadcast %117 : vector<1x1024xf32> to vector<3x1024xf32>
    %120 = arith.mulf %118, %119 : vector<3x1024xf32>
    %121 = arith.addf %115, %120 : vector<3x1024xf32>
    %cst_14 = arith.constant 0.000000e+00 : f32
    %122 = vector.broadcast %cst_14 : f32 to vector<3x1024xf32>
    %123 = arith.maximumf %121, %122 : vector<3x1024xf32>
    %c0_15 = arith.constant 0 : index
    %c0_16 = arith.constant 0 : index
    %124 = vector.load %arg8[%c0_15, %c0_16] : memref<3x1024xf32, #tpu.memory_space<vmem>>, vector<3x1024xf32>
    tpu.vector_store %arg8[%c0_15, %c0_16], %123 {strides = array<i32>} : memref<3x1024xf32, #tpu.memory_space<vmem>>, vector<3x1024xf32>,
    return
  }
  func.func @transform_0(%arg0: i32) -> (i32, i32) {
    %c0_i32 = arith.constant 0 : i32
    %c0_i32_0 = arith.constant 0 : i32
    return %c0_i32, %arg0 : i32, i32
  }
  func.func @transform_1(%arg0: i32) -> (i32, i32) {
    %c0_i32 = arith.constant 0 : i32
    %c0_i32_0 = arith.constant 0 : i32
    %c0_i32_1 = arith.constant 0 : i32
    return %c0_i32, %c0_i32_0 : i32, i32
  }
  func.func @transform_2(%arg0: i32) -> (i32, i32) {
    %c0_i32 = arith.constant 0 : i32
    %c0_i32_0 = arith.constant 0 : i32
    %c0_i32_1 = arith.constant 0 : i32
    return %c0_i32, %c0_i32_0 : i32, i32
  }
  func.func @transform_3(%arg0: i32) -> (i32, i32) {
    %c0_i32 = arith.constant 0 : i32
    %c0_i32_0 = arith.constant 0 : i32
    %c0_i32_1 = arith.constant 0 : i32
    return %c0_i32, %c0_i32_0 : i32, i32
  }
  func.func @transform_4(%arg0: i32) -> (i32, i32) {
    %c0_i32 = arith.constant 0 : i32
    %c0_i32_0 = arith.constant 0 : i32
    %c0_i32_1 = arith.constant 0 : i32
    return %c0_i32, %c0_i32_0 : i32, i32
  }
  func.func @transform_5(%arg0: i32) -> (i32, i32) {
    %c0_i32 = arith.constant 0 : i32
    %c0_i32_0 = arith.constant 0 : i32
    %c0_i32_1 = arith.constant 0 : i32
    return %c0_i32, %c0_i32_0 : i32, i32
  }
  func.func @transform_6(%arg0: i32) -> (i32, i32) {
    %c0_i32 = arith.constant 0 : i32
    %c0_i32_0 = arith.constant 0 : i32
    %c0_i32_1 = arith.constant 0 : i32
    return %c0_i32, %c0_i32_0 : i32, i32
  }
  func.func @transform_7(%arg0: i32) -> (i32, i32) {
    %c0_i32 = arith.constant 0 : i32
    %c0_i32_0 = arith.constant 0 : i32
    return %c0_i32, %arg0 : i32, i32
  }
}

</mosaic_0001>

<bundles_post_ra>
// kernel: tpu_custom_call.1
= control target key start
LH: loop header
LB: loop body
LE: loop exit
PB: predicated region body
PF: predicated region fallthrough
CT: control target
= control target key end

     0   :  { %12 = vsyncpa [#allocation3], 0  ;;  %s2293_s0 = inlined_call_operand.hbm [shape: f32[5,1536], index: 0, kind: input, shape index: {}]   ;;  %s2294_s1 = inlined_call_operand.vmem [shape: f32[8,5], index: 1, kind: input, shape index: {}]   ;;  %s2295_s2 = inlined_call_operand.vmem [shape: f32[8,1], index: 2, kind: input, shape index: {}]   ;;  %s2296_s3 = inlined_call_operand.vmem [shape: f32[5,8], index: 3, kind: input, shape index: {}]   ;;  %s2297_s4 = inlined_call_operand.vmem [shape: f32[5,1], index: 4, kind: input, shape index: {}]   ;;  %s2298_s5 = inlined_call_operand.vmem [shape: f32[3,5], index: 5, kind: input, shape index: {}]   ;;  %s2299_s6 = inlined_call_operand.vmem [shape: f32[3,1], index: 6, kind: input, shape index: {}]   ;;  %s2300_s7 = inlined_call_operand.hbm [shape: f32[3,1536], index: 7, kind: output, shape index: {}]  }
   0x1   :  { %14 = vsyncpa [#allocation3 + $0x1], 0 }
   0x2   :  { %15 = vsyncpa [#allocation4], 0 }
   0x3   :  { %17 = vsyncpa [#allocation4 + $0x1], 0  ;;  %s1648_s24 = smov 0   ;;  %s1650_s25 = smov 0  }
   0x4   :  { %s1652_s26 = smov 0   ;;  %s1654_s27 = smov 0  }
   0x5 LB: > { %s1669_s28 = sadd.s32 4294967295, %s1596_s27   ;;  %s1414_s29 = sadd.s32 4294967294, %s1596_s27   ;;  %s1596_s27 = sphi %s1654_s27, %s2335_s27   ;;  %s1592_s26 = sphi %s1652_s26, %s2334_s26   ;;  %s1588_s25 = sphi %s1650_s25, %s2333_s25   ;;  %s1584_s24 = sphi %s1648_s24, %s2332_s24  }
   0x6   : > { %s1673_s30 = sadd.s32 1, %s1596_s27   ;;  %s30_s8 = sadd.s32 1, %s1592_s26 }
   0x7   : > { %s27_s9 = ssub.s32 %s1596_s27, %s1673_s30  ;;  %p37_p0 = scmp.ne.s32.totalorder %s1592_s26, %s1588_s25 }
   0x8   : > { %p28_p1 = scmp.eq.s32.totalorder %s27_s9, 0  ;;  %p38_p2 = scmp.eq.s32.totalorder %s1596_s27, 0 }
   0x9   : > { %p43_p3 = scmp.ne.s32.totalorder %s1588_s25, %s1584_s24  ;;  %p44_p4 = scmp.eq.s32.totalorder %s1669_s28, 0 }
   0xa   : > { %s1685_s10 = scalar_select %p28_p1, %s1592_s26, %s30_s8  }
   0xb   : > { %p39_p5 = por %p38_p2, %p37_p0  ;;  %p1687_p6 = por %p44_p4, %p43_p3 }
   0xc   : > { %2306 = sst [smem:[#allocation8_spill]] %s1685_s10  ;;  %p193_p7 = scmp.eq.s32.totalorder %s1669_s28, 1 }
   0xd   : > { %p199_p8 = scmp.eq.s32.totalorder %s1414_s29, 1  ;;  %p2301_p11 = scmp.ge.s32.totalorder %s1596_s27, 2 }
   0xe   : > { %p1692_p9 = por %p193_p7, %p37_p0 }
   0xf   : > { %p1696_p10 = por %p199_p8, %p43_p3  ;;  %233 = sbr.rel (%p2301_p11) target bundleno = 51 (0x33), region = 40 }
  0x10   : > { %s2308_s12 = scalar_select %p1692_p9, 1, 0 }
  0x11   : > { %s2309_s13 = scalar_select %p1696_p10, 1, 0 }
  0x14   : > { %236 = sbr.rel (!%p39_p5) target bundleno = 51 (0x33), region = 44  ;;  %s237_s14 = sand.u32 (%p39_p5), 1, %s1592_s26  }
  0x15   : > { %s1418_s15 = sshll.u32 (%p39_p5), %s1596_s27, 3  ;;  %s1417_s16 = sshll.u32 (%p39_p5), %s237_s14, 6 }
  0x16   : > { %s243_s17 = ssub.s32 (%p39_p5), 12, %s1418_s15  ;;  %s1708_s20 = scalar_lea.sflag (%p39_p5), [#allocation3], %s237_s14 }
  0x17   : > { %p244_p12 = scmp.lt.s32.totalorder (%p39_p5), %s243_s17, 8  ;;  %s241_s21 = scalar_lea.vmem (%p39_p5), [#allocation2], %s1417_s16 }
  0x19   : > { %s2337_s17 = smov (!%p244_p12, %s243_s17), 8 }
  0x1a   : > { %s1705_s18 = sshll.u32 %s2337_s17, 7 }
  0x1b   : > { %s248_s19 = ssub.s32 1024, %s1705_s18 }
  0x1c   : > { %249 = vsyncadd %s1708_s20, %s248_s19  ;;  %p1420_p13 = scmp.ne.s32.totalorder %s1705_s18, 0  ;;  %s1436_s22 = sshll.u32 %s1596_s27, 10 }
  0x1d   : > { %s252_s8 = scalar_lea.hbm %s2293_s0, %s1436_s22  ;;  %s255_s9 = sshll.u32 %s241_s21, 4  ;;  %s256_s9 = int_to_ptr.vmem [resolvable:$true] %s255_s9 }
  0x1e   : > { %s1506_s15 = scalar_lea.hbm %s252_s8, %s1705_s18  ;;  %s1510_s17 = scalar_lea.hbm %s2293_s0, 1536 }
  0x1f   : > { %p1507_p0 = scmp.ne.s32.totalorder %s252_s8, %s1506_s15  ;;  %p1511_p3 = scmp.lt.s32.totalorder %s252_s8, %s2293_s0 }
  0x20   : > { %p1512_p4 = scmp.lt.s32.totalorder %s1510_s17, %s1506_s15 }
  0x21   : > { %p1508_p1 = pnand %p1507_p0, %p1420_p13 }
  0x22   : > { %p1513_p5 = por %p1512_p4, %p1511_p3 }
  0x23   : > { %p1509_p2 = pneg %p1508_p1 }
  0x25   : > { %p1514_p7 = pnand %p1513_p5, %p1509_p2 }
  0x27   : > { %1517 = shalt.err (!%p1514_p7)
}
  0x28   : > { %s1518_s21 = scalar_lea.vmem %s256_s9, %s1705_s18  ;;  %s1598_s22 = smov [#allocation2]  }
  0x29   : > { %p1519_p8 = scmp.ne.s32.totalorder %s256_s9, %s1518_s21  ;;  %s1522_s23 = sshll.u32 %s1598_s22, 4  ;;  %s1523_s23 = int_to_ptr.vmem [resolvable:$false] %s1522_s23 }
  0x2a   : > { %s1524_s29 = scalar_lea.vmem %s1523_s23, 2048  ;;  %p1525_p1 = scmp.lt.s32.totalorder %s256_s9, %s1523_s23 }
  0x2b   : > { %p1520_p12 = pnand %p1519_p8, %p1420_p13  ;;  %p1526_p11 = scmp.lt.s32.totalorder %s1524_s29, %s1518_s21 }
  0x2d   : > { %p1521_p0 = pneg %p1520_p12  ;;  %p1527_p10 = por %p1526_p11, %p1525_p1 }
  0x2f   : > { %p1528_p9 = pnand %p1527_p10, %p1521_p0 }
  0x31   : > { %1531 = shalt.err (!%p1528_p9)
}
  0x32   : > { %258 = dma.hbm_to_vmem [thread:$0]  (%p1420_p13), %s252_s8, %s1705_s18, %s256_s9, %s1708_s20  }
  0x33 PF: > { %p1424_p2 = scmp.ge.s32.totalorder %s1596_s27, 1  ;;  %p260_p3 = scmp.lt.s32.totalorder %s1596_s27, 3 }
  0x35   : > { %p261_p4 = pnand %p1424_p2, %p260_p3 }
  0x37   : > { %264 = sbr.rel (%p261_p4) target bundleno = 328 (0x148), region = 48 }
  0x3c   : > { %s1735_s10 = sand.u32 1, %s1588_s25  }
  0x3d   : > { %s1425_s15 = sshll.u32 %s1735_s10, 6  ;;  %s267_s14 = scalar_lea.sflag [#allocation3], %s1735_s10 }
  0x3e   : > { %s1739_s16 = scalar_lea.vmem [#allocation2], %s1425_s15 }
  0x3f   : > { %1575 = dma.done.wait (%p1687_p6), %s267_s14, 1024  }
  0x40   : > { %1577 = vsyncadd (%p1687_p6), %s267_s14, 4294966272  ;;  %v1599_v0 = vmov 1   ;;  %v1600_v1 = vmov 0   ;;  %v319_v2 = vld [vmem:[%s2294_s1] sm:$0xff]  ;;  %v1601_v4 = vmov 2   ;;  %v1602_v5 = vmov 3  }
  0x41   : > { %1486 = vset.pattern.permute.xlu1 %v1599_v0  ;;  %1485 = vset.pattern.permute.xlu0 %v1600_v1  ;;  %v365_v3 = vld [vmem:[%s2295_s2] sm:$0xff]  ;;  %v1603_v6 = vmov 4   ;;  %v1604_v9 = vmov 6   ;;  %v1605_v12 = vmov 5   ;;  %v1606_v13 = vmov 7   ;;  %s1426_s14 = sshll.u32 %s1735_s10, 5 }
  0x42   : > { %380 = vperm.xlu1 %1486, %v319_v2   ;;  %322 = vperm.xlu0 %1485, %v319_v2   ;;  %v641_v7 = vld [vmem:[%s2297_s4] sm:$0x1f]  ;;  %v325_v14 = vlaneseq  ;;  %v1771_v19 = vld [vmem:[%s1739_s16 + $0x8] sm:$0x1f]  ;;  %v1774_v20 = vld [vmem:[%s1739_s16 + $0x10] sm:$0x1f] }
  0x43   : > { %v595_v8 = vld [vmem:[%s2296_s3] sm:$0x1f]  ;;  %v1777_v21 = vld [vmem:[%s1739_s16 + $0x18] sm:$0x1f]  ;;  %v1783_v23 = vld [vmem:[%s1739_s16 + $0x28] sm:$0x1f] }
  0x44   : > { %v1073_v10 = vld [vmem:[%s2299_s6] sm:$0x7]  ;;  %v326_v15 = vshrl.u32 %v325_v14, 7  ;;  %v1786_v24 = vld [vmem:[%s1739_s16 + $0x30] sm:$0x1f]  ;;  %s1324_s18 = scalar_lea.sflag [#allocation4], %s1735_s10 }
  0x45   : > { %v1027_v11 = vld [vmem:[%s2298_s5] sm:$0x7]  ;;  %v1789_v25 = vld [vmem:[%s1739_s16 + $0x38] sm:$0x1f]  ;;  %p2328_p6 = scmp.ne.s32.totalorder %s2308_s12, 0 }
  0x46   : > { %1487 = vset.pattern.permute.xlu1 %v1601_v4  ;;  %368 = vperm.xlu0 %1485, %v365_v3   ;;  %v1763_v16 = vsub.s32 1, %v326_v15  ;;  %v1766_v17 = vld [vmem:[%s1739_s16] sm:$0x1f]  ;;  %v1768_v18 = vsub.s32 0, %v326_v15  ;;  %v1793_v27 = vsub.s32 2, %v326_v15  ;;  %v1817_v39 = vsub.s32 3, %v326_v15 }
  0x47   : > { %432 = vperm.xlu1 %1487, %v319_v2   ;;  %v1780_v22 = vld [vmem:[%s1739_s16 + $0x20] sm:$0x1f]  ;;  %v1833_v47 = vsub.s32 4, %v326_v15  ;;  %s300_s16 = scalar_lea.vmem [#allocation5], %s1426_s14  ;;  %s1428_s20 = sshll.u32 (%p2328_p6), %s1669_s28, 3 }
  0x48   : > { %2310 = vst [vmem:[#allocation9_spill] sm:$0xff] %v1763_v16  ;;  %v386_v26 = vrot.slane %v1766_v17, %v1763_v16  ;;  %2311 = vst [vmem:[#allocation10_spill] sm:$0xff] %v1793_v27  ;;  %v390_v28 = vrot.slane %v1771_v19, %v1763_v16  ;;  %v394_v29 = vrot.slane %v1774_v20, %v1763_v16  ;;  %s1332_s8 = ssub.s32 (%p2328_p6), 12, %s1428_s20 }
  0x49   : > { %v398_v30 = vrot.slane %v1777_v21, %v1763_v16  ;;  %v328_v31 = vrot.slane %v1766_v17, %v1768_v18  ;;  %v402_v32 = vrot.slane %v1780_v22, %v1763_v16  ;;  %v406_v33 = vrot.slane %v1783_v23, %v1763_v16  ;;  %p1333_p9 = scmp.lt.s32.totalorder (%p2328_p6), %s1332_s8, 8 }
  0x4a   : > { %1488 = vset.pattern.permute.xlu0 %v1602_v5  ;;  %v410_v34 = vrot.slane %v1786_v24, %v1763_v16  ;;  %v332_v35 = vrot.slane %v1771_v19, %v1768_v18  ;;  %v414_v36 = vrot.slane %v1789_v25, %v1763_v16  ;;  %v336_v37 = vrot.slane %v1774_v20, %v1768_v18 }
  0x4b   : > { %1489 = vset.pattern.permute.xlu1 %v1603_v6  ;;  %484 = vperm.xlu0 %1488, %v319_v2   ;;  %v340_v38 = vrot.slane %v1777_v21, %v1768_v18  ;;  %v344_v40 = vrot.slane %v1780_v22, %v1768_v18  ;;  %v348_v41 = vrot.slane %v1783_v23, %v1768_v18 }
  0x4c   : > { %536 = vperm.xlu1 %1489, %v319_v2   ;;  %v352_v42 = vrot.slane %v1786_v24, %v1768_v18  ;;  %v356_v43 = vrot.slane %v1789_v25, %v1768_v18  ;;  %v438_v44 = vrot.slane %v1766_v17, %v1793_v27  ;;  %v442_v45 = vrot.slane %v1771_v19, %v1793_v27 }
  0x4d   : > { %v446_v46 = vrot.slane %v1774_v20, %v1793_v27  ;;  %v450_v48 = vrot.slane %v1777_v21, %v1793_v27  ;;  %v454_v49 = vrot.slane %v1780_v22, %v1793_v27  ;;  %v458_v50 = vrot.slane %v1783_v23, %v1793_v27 }
  0x4e   : > { %v462_v51 = vrot.slane %v1786_v24, %v1793_v27  ;;  %v466_v52 = vrot.slane %v1789_v25, %v1793_v27  ;;  %v490_v53 = vrot.slane %v1766_v17, %v1817_v39  ;;  %v494_v54 = vrot.slane %v1771_v19, %v1817_v39 }
  0x4f   : > { %1491 = vset.pattern.permute.xlu0 %v1600_v1 }
  0x50   : > { %1490 = vset.pattern.permute.xlu1 %v1600_v1  ;;  %644 = vperm.xlu0 %1491, %v641_v7   ;;  %v1877_v7 = vsub.s32 6, %v326_v15 }
  0x51   : > { %598 = vperm.xlu1 %1490, %v595_v8  }
  0x54   : > { %1494 = vset.pattern.permute.xlu0 %v1602_v5 }
  0x55   : > { %1492 = vset.pattern.permute.xlu1 %v1599_v0  ;;  %760 = vperm.xlu0 %1494, %v595_v8  }
  0x56   : > { %656 = vperm.xlu1 %1492, %v595_v8  }
  0x59   : > { %1497 = vset.pattern.permute.xlu0 %v1604_v9  ;;  %v1881_v9 = vsub.s32 7, %v326_v15 }
  0x5a   : > { %1493 = vset.pattern.permute.xlu1 %v1601_v4  ;;  %916 = vperm.xlu0 %1497, %v595_v8  }
  0x5b   : > { %708 = vperm.xlu1 %1493, %v595_v8  }
  0x5e   : > { %1500 = vset.pattern.permute.xlu0 %v1600_v1 }
  0x5f   : > { %1495 = vset.pattern.permute.xlu1 %v1603_v6  ;;  %1076 = vperm.xlu0 %1500, %v1073_v10  }
  0x60   : > { %812 = vperm.xlu1 %1495, %v595_v8  }
  0x63   : > { %1503 = vset.pattern.permute.xlu0 %v1602_v5 }
  0x64   : > { %1496 = vset.pattern.permute.xlu1 %v1605_v12  ;;  %1192 = vperm.xlu0 %1503, %v1027_v11  }
  0x65   : > { %864 = vperm.xlu1 %1496, %v595_v8  }
  0x68   : > { %1505 = vset.pattern.permute.xlu0 %v1603_v6 }
  0x69   : > { %1498 = vset.pattern.permute.xlu1 %v1606_v13 }
  0x6a   : > { %968 = vperm.xlu1 %1498, %v595_v8   ;;  %v1879_v8 = vsub.s32 5, %v326_v15 }
  0x6e   : > { %1499 = vset.pattern.permute.xlu1 %v1600_v1 }
  0x6f   : > { %1030 = vperm.xlu1 %1499, %v1027_v11  }
  0x73   : > { %1501 = vset.pattern.permute.xlu1 %v1599_v0 }
  0x74   : > { %1088 = vperm.xlu1 %1501, %v1027_v11  }
  0x78   : > { %1502 = vset.pattern.permute.xlu1 %v1601_v4 }
  0x79   : > { %1140 = vperm.xlu1 %1502, %v1027_v11  }
  0x7d   : > { %1504 = vset.pattern.permute.xlu1 %v1603_v6 }
  0x7e   : > { %1244 = vperm.xlu1 %1504, %v1027_v11  }
  0xbd   : > { %v381_v4 = vpop.permute.xlu1 %380  ;;  %v323_v5 = vpop.permute.xlu0 %322 }
  0xbe   : > { %v415_v10 = vmul.f32 %v386_v26, %v381_v4  ;;  %v416_v11 = vmul.f32 %v390_v28, %v381_v4  ;;  %v417_v12 = vmul.f32 %v394_v29, %v381_v4  ;;  %v418_v13 = vmul.f32 %v398_v30, %v381_v4 }
  0xbf   : > { %v419_v14 = vmul.f32 %v402_v32, %v381_v4  ;;  %v420_v2 = vmul.f32 %v406_v33, %v381_v4  ;;  %v421_v1 = vmul.f32 %v410_v34, %v381_v4  ;;  %v422_v0 = vmul.f32 %v414_v36, %v381_v4 }
  0xc0   : > { %v357_v3 = vmul.f32 %v328_v31, %v323_v5  ;;  %v358_v63 = vmul.f32 %v332_v35, %v323_v5  ;;  %v359_v62 = vmul.f32 %v336_v37, %v323_v5  ;;  %v360_v61 = vmul.f32 %v340_v38, %v323_v5 }
  0xc1   : > { %v361_v60 = vmul.f32 %v344_v40, %v323_v5  ;;  %v362_v6 = vmul.f32 %v348_v41, %v323_v5  ;;  %v363_v59 = vmul.f32 %v352_v42, %v323_v5  ;;  %v364_v58 = vmul.f32 %v356_v43, %v323_v5  ;;  %v369_v57 = vpop.permute.xlu0 %368 }
  0xc2   : > { %v371_v56 = vadd.f32 %v369_v57, %v357_v3  ;;  %v372_v15 = vadd.f32 %v369_v57, %v358_v63  ;;  %v373_v55 = vadd.f32 %v369_v57, %v359_v62  ;;  %v374_v26 = vadd.f32 %v369_v57, %v360_v61  ;;  %v433_v33 = vpop.permute.xlu1 %432 }
  0xc3   : > { %v375_v28 = vadd.f32 %v369_v57, %v361_v60  ;;  %v376_v29 = vadd.f32 %v369_v57, %v362_v6  ;;  %v377_v30 = vadd.f32 %v369_v57, %v363_v59  ;;  %v378_v32 = vadd.f32 %v369_v57, %v364_v58 }
  0xc4   : > { %v423_v34 = vadd.f32 %v415_v10, %v371_v56  ;;  %v424_v36 = vadd.f32 %v416_v11, %v372_v15  ;;  %v425_v31 = vadd.f32 %v417_v12, %v373_v55  ;;  %v426_v35 = vadd.f32 %v418_v13, %v374_v26 }
  0xc5   : > { %v427_v37 = vadd.f32 %v419_v14, %v375_v28  ;;  %v428_v38 = vadd.f32 %v420_v2, %v376_v29  ;;  %v429_v40 = vadd.f32 %v421_v1, %v377_v30  ;;  %v430_v41 = vadd.f32 %v422_v0, %v378_v32 }
  0xc6   : > { %v467_v42 = vmul.f32 %v438_v44, %v433_v33  ;;  %v468_v43 = vmul.f32 %v442_v45, %v433_v33  ;;  %v469_v57 = vmul.f32 %v446_v46, %v433_v33  ;;  %v470_v55 = vmul.f32 %v450_v48, %v433_v33  ;;  %v485_v58 = vpop.permute.xlu0 %484 }
  0xc7   : > { %v471_v56 = vmul.f32 %v454_v49, %v433_v33  ;;  %v472_v44 = vmul.f32 %v458_v50, %v433_v33  ;;  %v473_v45 = vmul.f32 %v462_v51, %v433_v33  ;;  %v474_v46 = vmul.f32 %v466_v52, %v433_v33  ;;  %v537_v13 = vpop.permute.xlu1 %536 }
  0xc8   : > { %v475_v59 = vadd.f32 %v467_v42, %v423_v34  ;;  %v476_v60 = vadd.f32 %v468_v43, %v424_v36  ;;  %v477_v48 = vadd.f32 %v469_v57, %v425_v31  ;;  %v478_v61 = vadd.f32 %v470_v55, %v426_v35 }
  0xc9   : > { %v479_v62 = vadd.f32 %v471_v56, %v427_v37  ;;  %v480_v63 = vadd.f32 %v472_v44, %v428_v38  ;;  %v481_v49 = vadd.f32 %v473_v45, %v429_v40  ;;  %v482_v0 = vadd.f32 %v474_v46, %v430_v41 }
  0xca   : > { %v519_v50 = vmul.f32 %v490_v53, %v485_v58  ;;  %v520_v51 = vmul.f32 %v494_v54, %v485_v58  ;;  %v2312_v52 = vrot.slane %v1774_v20, %v1817_v39  ;;  %v2313_v2 = vrot.slane %v1777_v21, %v1817_v39 }
  0xcb   : > { %v2314_v4 = vrot.slane %v1780_v22, %v1817_v39  ;;  %v2315_v6 = vrot.slane %v1783_v23, %v1817_v39  ;;  %v2316_v10 = vrot.slane %v1786_v24, %v1817_v39  ;;  %v2317_v11 = vrot.slane %v1789_v25, %v1817_v39 }
  0xcc   : > { %v521_v1 = vmul.f32 %v2312_v52, %v485_v58  ;;  %v522_v3 = vmul.f32 %v2313_v2, %v485_v58  ;;  %v527_v14 = vadd.f32 %v519_v50, %v475_v59  ;;  %v528_v15 = vadd.f32 %v520_v51, %v476_v60  ;;  %v599_v2 = vpop.permute.xlu1 %598 }
  0xcd   : > { %v523_v5 = vmul.f32 %v2314_v4, %v485_v58  ;;  %v524_v53 = vmul.f32 %v2315_v6, %v485_v58  ;;  %v525_v54 = vmul.f32 %v2316_v10, %v485_v58  ;;  %v526_v12 = vmul.f32 %v2317_v11, %v485_v58 }
  0xce   : > { %v529_v26 = vadd.f32 %v521_v1, %v477_v48  ;;  %v530_v28 = vadd.f32 %v522_v3, %v478_v61  ;;  %v2318_v34 = vrot.slane %v1766_v17, %v1833_v47  ;;  %v2319_v31 = vrot.slane %v1771_v19, %v1833_v47 }
  0xcf   : > { %v531_v29 = vadd.f32 %v523_v5, %v479_v62  ;;  %v532_v30 = vadd.f32 %v524_v53, %v480_v63  ;;  %v533_v32 = vadd.f32 %v525_v54, %v481_v49  ;;  %v534_v33 = vadd.f32 %v526_v12, %v482_v0  ;;  %v645_v0 = vpop.permute.xlu0 %644 }
  0xd0   : > { %v571_v36 = vmul.f32 %v2318_v34, %v537_v13  ;;  %v572_v35 = vmul.f32 %v2319_v31, %v537_v13  ;;  %v2320_v37 = vrot.slane %v1774_v20, %v1833_v47  ;;  %v2321_v40 = vrot.slane %v1777_v21, %v1833_v47 }
  0xd1   : > { %v2322_v42 = vrot.slane %v1780_v22, %v1833_v47  ;;  %v2323_v17 = vrot.slane %v1783_v23, %v1833_v47  ;;  %v2324_v19 = vrot.slane %v1786_v24, %v1833_v47  ;;  %v2325_v20 = vrot.slane %v1789_v25, %v1833_v47 }
  0xd2   : > { %v573_v38 = vmul.f32 %v2320_v37, %v537_v13  ;;  %v574_v41 = vmul.f32 %v2321_v40, %v537_v13  ;;  %v579_v44 = vadd.f32 %v571_v36, %v527_v14  ;;  %v580_v45 = vadd.f32 %v572_v35, %v528_v15 }
  0xd3   : > { %v575_v43 = vmul.f32 %v2322_v42, %v537_v13  ;;  %v576_v57 = vmul.f32 %v2323_v17, %v537_v13  ;;  %v577_v55 = vmul.f32 %v2324_v19, %v537_v13  ;;  %v578_v56 = vmul.f32 %v2325_v20, %v537_v13  ;;  %v761_v31 = vpop.permute.xlu0 %760 }
  0xd4   : > { %v581_v21 = vadd.f32 %v573_v38, %v529_v26  ;;  %v582_v46 = vadd.f32 %v574_v41, %v530_v28  ;;  %v1955_v48 = vmax.f32 %v579_v44, 0.0  ;;  %v1957_v23 = vmax.f32 %v580_v45, 0.0 }
  0xd5   : > { %v583_v58 = vadd.f32 %v575_v43, %v531_v29  ;;  %v584_v59 = vadd.f32 %v576_v57, %v532_v30  ;;  %v585_v22 = vadd.f32 %v577_v55, %v533_v32  ;;  %v586_v60 = vadd.f32 %v578_v56, %v534_v33 }
  0xd6   : > { %v1959_v61 = vmax.f32 %v581_v21, 0.0  ;;  %v1961_v24 = vmax.f32 %v582_v46, 0.0  ;;  %v604_v50 = vrot.slane %v1955_v48, %v1768_v18  ;;  %v608_v51 = vrot.slane %v1957_v23, %v1768_v18  ;;  %v657_v46 = vpop.permute.xlu1 %656 }
  0xd7   : > { %v1963_v62 = vmax.f32 %v583_v58, 0.0  ;;  %v1965_v25 = vmax.f32 %v584_v59, 0.0  ;;  %v1967_v63 = vmax.f32 %v585_v22, 0.0  ;;  %v1969_v49 = vmax.f32 %v586_v60, 0.0 }
  0xd8   : > { %v612_v52 = vrot.slane %v1959_v61, %v1768_v18  ;;  %v616_v1 = vrot.slane %v1961_v24, %v1768_v18  ;;  %v633_v53 = vmul.f32 %v604_v50, %v599_v2  ;;  %v634_v10 = vmul.f32 %v608_v51, %v599_v2 }
  0xd9   : > { %v620_v3 = vrot.slane %v1963_v62, %v1768_v18  ;;  %v624_v4 = vrot.slane %v1965_v25, %v1768_v18  ;;  %v628_v5 = vrot.slane %v1967_v63, %v1768_v18  ;;  %v632_v6 = vrot.slane %v1969_v49, %v1768_v18 }
  0xda   : > { %v635_v54 = vmul.f32 %v612_v52, %v599_v2  ;;  %v636_v11 = vmul.f32 %v616_v1, %v599_v2  ;;  %v647_v26 = vadd.f32 %v645_v0, %v633_v53  ;;  %v648_v28 = vadd.f32 %v645_v0, %v634_v10 }
  0xdb   : > { %v637_v12 = vmul.f32 %v620_v3, %v599_v2  ;;  %v638_v13 = vmul.f32 %v624_v4, %v599_v2  ;;  %v639_v14 = vmul.f32 %v628_v5, %v599_v2  ;;  %v640_v15 = vmul.f32 %v632_v6, %v599_v2 }
  0xdc   : > { %v649_v29 = vadd.f32 %v645_v0, %v635_v54  ;;  %v650_v30 = vadd.f32 %v645_v0, %v636_v11  ;;  %v766_v35 = vrot.slane %v1955_v48, %v1817_v39  ;;  %v770_v37 = vrot.slane %v1957_v23, %v1817_v39 }
  0xdd   : > { %v651_v32 = vadd.f32 %v645_v0, %v637_v12  ;;  %v652_v33 = vadd.f32 %v645_v0, %v638_v13  ;;  %v653_v34 = vadd.f32 %v645_v0, %v639_v14  ;;  %v654_v36 = vadd.f32 %v645_v0, %v640_v15 }
  0xde   : > { %v774_v38 = vrot.slane %v1959_v61, %v1817_v39  ;;  %v778_v40 = vrot.slane %v1961_v24, %v1817_v39  ;;  %v782_v41 = vrot.slane %v1963_v62, %v1817_v39  ;;  %v786_v42 = vrot.slane %v1965_v25, %v1817_v39 }
  0xdf   : > { %v790_v43 = vrot.slane %v1967_v63, %v1817_v39  ;;  %v794_v17 = vrot.slane %v1969_v49, %v1817_v39  ;;  %v2003_v57 = vmul.f32 %v766_v35, %v761_v31  ;;  %v2005_v19 = vmul.f32 %v770_v37, %v761_v31  ;;  %v917_v37 = vpop.permute.xlu0 %916 }
  0xe0   : > { %v2007_v55 = vmul.f32 %v774_v38, %v761_v31  ;;  %v2009_v20 = vmul.f32 %v778_v40, %v761_v31  ;;  %v2011_v56 = vmul.f32 %v782_v41, %v761_v31  ;;  %v2013_v44 = vmul.f32 %v786_v42, %v761_v31 }
  0xe1   : > { %v2015_v45 = vmul.f32 %v790_v43, %v761_v31  ;;  %v2017_v21 = vmul.f32 %v794_v17, %v761_v31  ;;  %v662_v58 = vrot.slane %v1955_v48, %v1763_v16  ;;  %v666_v59 = vrot.slane %v1957_v23, %v1763_v16 }
  0xe2   : > { %v670_v22 = vrot.slane %v1959_v61, %v1763_v16  ;;  %v674_v60 = vrot.slane %v1961_v24, %v1763_v16  ;;  %v678_v0 = vrot.slane %v1963_v62, %v1763_v16  ;;  %v682_v50 = vrot.slane %v1965_v25, %v1763_v16 }
  0xe3   : > { %v686_v51 = vrot.slane %v1967_v63, %v1763_v16  ;;  %v690_v52 = vrot.slane %v1969_v49, %v1763_v16  ;;  %v691_v1 = vmul.f32 %v662_v58, %v657_v46  ;;  %v692_v2 = vmul.f32 %v666_v59, %v657_v46  ;;  %v709_v59 = vpop.permute.xlu1 %708 }
  0xe4   : > { %v693_v3 = vmul.f32 %v670_v22, %v657_v46  ;;  %v694_v4 = vmul.f32 %v674_v60, %v657_v46  ;;  %v695_v5 = vmul.f32 %v678_v0, %v657_v46  ;;  %v696_v6 = vmul.f32 %v682_v50, %v657_v46 }
  0xe5   : > { %v697_v53 = vmul.f32 %v686_v51, %v657_v46  ;;  %v698_v10 = vmul.f32 %v690_v52, %v657_v46  ;;  %v699_v54 = vadd.f32 %v691_v1, %v647_v26  ;;  %v700_v11 = vadd.f32 %v692_v2, %v648_v28 }
  0xe6   : > { %v701_v12 = vadd.f32 %v693_v3, %v649_v29  ;;  %v702_v13 = vadd.f32 %v694_v4, %v650_v30  ;;  %v703_v14 = vadd.f32 %v695_v5, %v651_v32  ;;  %v704_v15 = vadd.f32 %v696_v6, %v652_v33 }
  0xe7   : > { %v705_v31 = vadd.f32 %v697_v53, %v653_v34  ;;  %v706_v35 = vadd.f32 %v698_v10, %v654_v36  ;;  %v922_v38 = vrot.slane %v1955_v48, %v1877_v7  ;;  %v926_v40 = vrot.slane %v1957_v23, %v1877_v7 }
  0xe8   : > { %v930_v41 = vrot.slane %v1959_v61, %v1877_v7  ;;  %v934_v26 = vrot.slane %v1961_v24, %v1877_v7  ;;  %v938_v28 = vrot.slane %v1963_v62, %v1877_v7  ;;  %v942_v29 = vrot.slane %v1965_v25, %v1877_v7 }
  0xe9   : > { %v946_v30 = vrot.slane %v1967_v63, %v1877_v7  ;;  %v950_v32 = vrot.slane %v1969_v49, %v1877_v7  ;;  %v2051_v33 = vmul.f32 %v922_v38, %v917_v37  ;;  %v2053_v34 = vmul.f32 %v926_v40, %v917_v37 }
  0xea   : > { %v2055_v36 = vmul.f32 %v930_v41, %v917_v37  ;;  %v2057_v42 = vmul.f32 %v934_v26, %v917_v37  ;;  %v2059_v43 = vmul.f32 %v938_v28, %v917_v37  ;;  %v2061_v17 = vmul.f32 %v942_v29, %v917_v37 }
  0xeb   : > { %v2063_v46 = vmul.f32 %v946_v30, %v917_v37  ;;  %v2065_v58 = vmul.f32 %v950_v32, %v917_v37  ;;  %v714_v7 = vrot.slane %v1955_v48, %v1793_v27  ;;  %v718_v22 = vrot.slane %v1957_v23, %v1793_v27 }
  0xec   : > { %v722_v60 = vrot.slane %v1959_v61, %v1793_v27  ;;  %v726_v0 = vrot.slane %v1961_v24, %v1793_v27  ;;  %v730_v50 = vrot.slane %v1963_v62, %v1793_v27  ;;  %v734_v51 = vrot.slane %v1965_v25, %v1793_v27 }
  0xed   : > { %v738_v52 = vrot.slane %v1967_v63, %v1793_v27  ;;  %v742_v1 = vrot.slane %v1969_v49, %v1793_v27  ;;  %v743_v2 = vmul.f32 %v714_v7, %v709_v59  ;;  %v744_v3 = vmul.f32 %v718_v22, %v709_v59 }
  0xee   : > { %v745_v4 = vmul.f32 %v722_v60, %v709_v59  ;;  %v746_v5 = vmul.f32 %v726_v0, %v709_v59  ;;  %v747_v6 = vmul.f32 %v730_v50, %v709_v59  ;;  %v748_v53 = vmul.f32 %v734_v51, %v709_v59  ;;  %v813_v60 = vpop.permute.xlu1 %812 }
  0xef   : > { %v749_v10 = vmul.f32 %v738_v52, %v709_v59  ;;  %v750_v37 = vmul.f32 %v742_v1, %v709_v59  ;;  %v751_v38 = vadd.f32 %v743_v2, %v699_v54  ;;  %v752_v40 = vadd.f32 %v744_v3, %v700_v11 }
  0xf0   : > { %v753_v41 = vadd.f32 %v745_v4, %v701_v12  ;;  %v754_v26 = vadd.f32 %v746_v5, %v702_v13  ;;  %v755_v28 = vadd.f32 %v747_v6, %v703_v14  ;;  %v756_v29 = vadd.f32 %v748_v53, %v704_v15 }
  0xf1   : > { %v757_v30 = vadd.f32 %v749_v10, %v705_v31  ;;  %v758_v32 = vadd.f32 %v750_v37, %v706_v35  ;;  %v803_v16 = vadd.f32 %v2003_v57, %v751_v38  ;;  %v804_v27 = vadd.f32 %v2005_v19, %v752_v40 }
  0xf2   : > { %v805_v7 = vadd.f32 %v2007_v55, %v753_v41  ;;  %v806_v22 = vadd.f32 %v2009_v20, %v754_v26  ;;  %v807_v0 = vadd.f32 %v2011_v56, %v755_v28  ;;  %v808_v54 = vadd.f32 %v2013_v44, %v756_v29  ;;  %v865_v10 = vpop.permute.xlu1 %864 }
  0xf3   : > { %v809_v11 = vadd.f32 %v2015_v45, %v757_v30  ;;  %v810_v12 = vadd.f32 %v2017_v21, %v758_v32  ;;  %v818_v13 = vrot.slane %v1955_v48, %v1833_v47  ;;  %v822_v57 = vrot.slane %v1957_v23, %v1833_v47 }
  0xf4   : > { %v826_v19 = vrot.slane %v1959_v61, %v1833_v47  ;;  %v830_v55 = vrot.slane %v1961_v24, %v1833_v47  ;;  %v834_v20 = vrot.slane %v1963_v62, %v1833_v47  ;;  %v838_v56 = vrot.slane %v1965_v25, %v1833_v47 }
  0xf5   : > { %v842_v44 = vrot.slane %v1967_v63, %v1833_v47  ;;  %v846_v45 = vrot.slane %v1969_v49, %v1833_v47  ;;  %v847_v21 = vmul.f32 %v818_v13, %v813_v60  ;;  %v848_v14 = vmul.f32 %v822_v57, %v813_v60 }
  0xf6   : > { %v849_v15 = vmul.f32 %v826_v19, %v813_v60  ;;  %v850_v31 = vmul.f32 %v830_v55, %v813_v60  ;;  %v851_v35 = vmul.f32 %v834_v20, %v813_v60  ;;  %v852_v59 = vmul.f32 %v838_v56, %v813_v60 }
  0xf7   : > { %v853_v50 = vmul.f32 %v842_v44, %v813_v60  ;;  %v854_v51 = vmul.f32 %v846_v45, %v813_v60  ;;  %v855_v52 = vadd.f32 %v847_v21, %v803_v16  ;;  %v856_v1 = vadd.f32 %v848_v14, %v804_v27  ;;  %v969_v14 = vpop.permute.xlu1 %968 }
  0xf8   : > { %v857_v2 = vadd.f32 %v849_v15, %v805_v7  ;;  %v858_v3 = vadd.f32 %v850_v31, %v806_v22  ;;  %v859_v4 = vadd.f32 %v851_v35, %v807_v0  ;;  %v860_v5 = vadd.f32 %v852_v59, %v808_v54 }
  0xf9   : > { %v861_v6 = vadd.f32 %v853_v50, %v809_v11  ;;  %v862_v53 = vadd.f32 %v854_v51, %v810_v12  ;;  %v870_v37 = vrot.slane %v1955_v48, %v1879_v8  ;;  %v874_v38 = vrot.slane %v1957_v23, %v1879_v8 }
  0xfa   : > { %v878_v40 = vrot.slane %v1959_v61, %v1879_v8  ;;  %v882_v16 = vrot.slane %v1961_v24, %v1879_v8  ;;  %v886_v27 = vrot.slane %v1963_v62, %v1879_v8  ;;  %v890_v41 = vrot.slane %v1965_v25, %v1879_v8 }
  0xfb   : > { %v894_v26 = vrot.slane %v1967_v63, %v1879_v8  ;;  %v898_v28 = vrot.slane %v1969_v49, %v1879_v8  ;;  %v899_v29 = vmul.f32 %v870_v37, %v865_v10  ;;  %v900_v30 = vmul.f32 %v874_v38, %v865_v10 }
  0xfc   : > { %v901_v32 = vmul.f32 %v878_v40, %v865_v10  ;;  %v902_v7 = vmul.f32 %v882_v16, %v865_v10  ;;  %v903_v22 = vmul.f32 %v886_v27, %v865_v10  ;;  %v904_v60 = vmul.f32 %v890_v41, %v865_v10  ;;  %v1077_v27 = vpop.permute.xlu0 %1076 }
  0xfd   : > { %v905_v0 = vmul.f32 %v894_v26, %v865_v10  ;;  %v906_v54 = vmul.f32 %v898_v28, %v865_v10  ;;  %v907_v11 = vadd.f32 %v899_v29, %v855_v52  ;;  %v908_v12 = vadd.f32 %v900_v30, %v856_v1  ;;  %v1031_v30 = vpop.permute.xlu1 %1030 }
  0xfe   : > { %v909_v13 = vadd.f32 %v901_v32, %v857_v2  ;;  %v910_v57 = vadd.f32 %v902_v7, %v858_v3  ;;  %v911_v19 = vadd.f32 %v903_v22, %v859_v4  ;;  %v912_v55 = vadd.f32 %v904_v60, %v860_v5 }
  0xff   : > { %v913_v20 = vadd.f32 %v905_v0, %v861_v6  ;;  %v914_v56 = vadd.f32 %v906_v54, %v862_v53  ;;  %v959_v44 = vadd.f32 %v2051_v33, %v907_v11  ;;  %v960_v8 = vadd.f32 %v2053_v34, %v908_v12 }
 0x100   : > { %v961_v45 = vadd.f32 %v2055_v36, %v909_v13  ;;  %v962_v21 = vadd.f32 %v2057_v42, %v910_v57  ;;  %v963_v15 = vadd.f32 %v2059_v43, %v911_v19  ;;  %v964_v31 = vadd.f32 %v2061_v17, %v912_v55 }
 0x101   : > { %v965_v35 = vadd.f32 %v2063_v46, %v913_v20  ;;  %v966_v59 = vadd.f32 %v2065_v58, %v914_v56  ;;  %v974_v50 = vrot.slane %v1955_v48, %v1881_v9  ;;  %v978_v33 = vrot.slane %v1957_v23, %v1881_v9 }
 0x102   : > { %v982_v34 = vrot.slane %v1959_v61, %v1881_v9  ;;  %v986_v36 = vrot.slane %v1961_v24, %v1881_v9  ;;  %v990_v42 = vrot.slane %v1963_v62, %v1881_v9  ;;  %v994_v43 = vrot.slane %v1965_v25, %v1881_v9 }
 0x103   : > { %v998_v17 = vrot.slane %v1967_v63, %v1881_v9  ;;  %v1002_v48 = vrot.slane %v1969_v49, %v1881_v9  ;;  %v1003_v46 = vmul.f32 %v974_v50, %v969_v14  ;;  %v1004_v23 = vmul.f32 %v978_v33, %v969_v14 }
 0x104   : > { %v1005_v58 = vmul.f32 %v982_v34, %v969_v14  ;;  %v1006_v51 = vmul.f32 %v986_v36, %v969_v14  ;;  %v1007_v61 = vmul.f32 %v990_v42, %v969_v14  ;;  %v1008_v52 = vmul.f32 %v994_v43, %v969_v14 }
 0x105   : > { %v1009_v1 = vmul.f32 %v998_v17, %v969_v14  ;;  %v1010_v24 = vmul.f32 %v1002_v48, %v969_v14  ;;  %v1011_v2 = vadd.f32 %v1003_v46, %v959_v44  ;;  %v1012_v3 = vadd.f32 %v1004_v23, %v960_v8 }
 0x106   : > { %v1013_v62 = vadd.f32 %v1005_v58, %v961_v45  ;;  %v1014_v4 = vadd.f32 %v1006_v51, %v962_v21  ;;  %v1015_v5 = vadd.f32 %v1007_v61, %v963_v15  ;;  %v1016_v25 = vadd.f32 %v1008_v52, %v964_v31  ;;  %v1193_v31 = vpop.permute.xlu0 %1192  ;;  %v1089_v52 = vpop.permute.xlu1 %1088 }
 0x107   : > { %v1017_v6 = vadd.f32 %v1009_v1, %v965_v35  ;;  %v1018_v53 = vadd.f32 %v1010_v24, %v966_v59  ;;  %v2147_v63 = vmax.f32 %v1011_v2, 0.0  ;;  %v2149_v10 = vmax.f32 %v1012_v3, 0.0  ;;  %v2326_v1 = vld [vmem:[#allocation9_spill] sm:$0xff] }
 0x108   : > { %v2151_v9 = vmax.f32 %v1013_v62, 0.0  ;;  %v2153_v49 = vmax.f32 %v1014_v4, 0.0  ;;  %v2155_v37 = vmax.f32 %v1015_v5, 0.0  ;;  %v2157_v38 = vmax.f32 %v1016_v25, 0.0 }
 0x109   : > { %v2159_v40 = vmax.f32 %v1017_v6, 0.0  ;;  %v2161_v16 = vmax.f32 %v1018_v53, 0.0  ;;  %v1036_v41 = vrot.slane %v2147_v63, %v1768_v18  ;;  %v1040_v26 = vrot.slane %v2149_v10, %v1768_v18 }
 0x10a   : > { %v1044_v28 = vrot.slane %v2151_v9, %v1768_v18  ;;  %v1048_v29 = vrot.slane %v2153_v49, %v1768_v18  ;;  %v1052_v32 = vrot.slane %v2155_v37, %v1768_v18  ;;  %v1056_v7 = vrot.slane %v2157_v38, %v1768_v18 }
 0x10b   : > { %v1060_v22 = vrot.slane %v2159_v40, %v1768_v18  ;;  %v1064_v60 = vrot.slane %v2161_v16, %v1768_v18  ;;  %v1065_v0 = vmul.f32 %v1036_v41, %v1031_v30  ;;  %v1066_v54 = vmul.f32 %v1040_v26, %v1031_v30 }
 0x10c   : > { %v1067_v11 = vmul.f32 %v1044_v28, %v1031_v30  ;;  %v1068_v12 = vmul.f32 %v1048_v29, %v1031_v30  ;;  %v1069_v13 = vmul.f32 %v1052_v32, %v1031_v30  ;;  %v1070_v57 = vmul.f32 %v1056_v7, %v1031_v30 }
 0x10d   : > { %v1071_v19 = vmul.f32 %v1060_v22, %v1031_v30  ;;  %v1072_v55 = vmul.f32 %v1064_v60, %v1031_v30  ;;  %v1079_v20 = vadd.f32 %v1077_v27, %v1065_v0  ;;  %v1080_v56 = vadd.f32 %v1077_v27, %v1066_v54 }
 0x10e   : > { %v1081_v44 = vadd.f32 %v1077_v27, %v1067_v11  ;;  %v1082_v8 = vadd.f32 %v1077_v27, %v1068_v12  ;;  %v1083_v45 = vadd.f32 %v1077_v27, %v1069_v13  ;;  %v1084_v21 = vadd.f32 %v1077_v27, %v1070_v57  ;;  %v1141_v13 = vpop.permute.xlu1 %1140  ;;  %v2327_v57 = vld [vmem:[#allocation10_spill] sm:$0xff] }
 0x10f   : > { %v1085_v14 = vadd.f32 %v1077_v27, %v1071_v19  ;;  %v1086_v15 = vadd.f32 %v1077_v27, %v1072_v55  ;;  %v1198_v18 = vrot.slane %v2147_v63, %v1817_v39  ;;  %v1202_v35 = vrot.slane %v2149_v10, %v1817_v39 }
 0x110   : > { %v1206_v59 = vrot.slane %v2151_v9, %v1817_v39  ;;  %v1210_v50 = vrot.slane %v2153_v49, %v1817_v39  ;;  %v1214_v33 = vrot.slane %v2155_v37, %v1817_v39  ;;  %v1218_v34 = vrot.slane %v2157_v38, %v1817_v39 }
 0x111   : > { %v1222_v36 = vrot.slane %v2159_v40, %v1817_v39  ;;  %v1226_v42 = vrot.slane %v2161_v16, %v1817_v39  ;;  %v1227_v43 = vmul.f32 %v1198_v18, %v1193_v31  ;;  %v1228_v17 = vmul.f32 %v1202_v35, %v1193_v31 }
 0x112   : > { %v1229_v48 = vmul.f32 %v1206_v59, %v1193_v31  ;;  %v1230_v46 = vmul.f32 %v1210_v50, %v1193_v31  ;;  %v1231_v23 = vmul.f32 %v1214_v33, %v1193_v31  ;;  %v1232_v58 = vmul.f32 %v1218_v34, %v1193_v31 }
 0x113   : > { %v1233_v51 = vmul.f32 %v1222_v36, %v1193_v31  ;;  %v1234_v61 = vmul.f32 %v1226_v42, %v1193_v31  ;;  %v1094_v24 = vrot.slane %v2147_v63, %v2326_v1  ;;  %v1098_v2 = vrot.slane %v2149_v10, %v2326_v1 }
 0x114   : > { %v1102_v3 = vrot.slane %v2151_v9, %v2326_v1  ;;  %v1106_v39 = vrot.slane %v2153_v49, %v2326_v1  ;;  %v1110_v62 = vrot.slane %v2155_v37, %v2326_v1  ;;  %v1114_v4 = vrot.slane %v2157_v38, %v2326_v1 }
 0x115   : > { %v1118_v5 = vrot.slane %v2159_v40, %v2326_v1  ;;  %v1122_v25 = vrot.slane %v2161_v16, %v2326_v1  ;;  %v1123_v6 = vmul.f32 %v1094_v24, %v1089_v52  ;;  %v1124_v53 = vmul.f32 %v1098_v2, %v1089_v52 }
 0x116   : > { %v1125_v27 = vmul.f32 %v1102_v3, %v1089_v52  ;;  %v1126_v41 = vmul.f32 %v1106_v39, %v1089_v52  ;;  %v1127_v26 = vmul.f32 %v1110_v62, %v1089_v52  ;;  %v1128_v28 = vmul.f32 %v1114_v4, %v1089_v52 }
 0x117   : > { %v1129_v29 = vmul.f32 %v1118_v5, %v1089_v52  ;;  %v1130_v30 = vmul.f32 %v1122_v25, %v1089_v52  ;;  %v1131_v32 = vadd.f32 %v1123_v6, %v1079_v20  ;;  %v1132_v7 = vadd.f32 %v1124_v53, %v1080_v56  ;;  %v1245_v25 = vpop.permute.xlu1 %1244 }
 0x118   : > { %v1133_v22 = vadd.f32 %v1125_v27, %v1081_v44  ;;  %v1134_v60 = vadd.f32 %v1126_v41, %v1082_v8  ;;  %v1135_v0 = vadd.f32 %v1127_v26, %v1083_v45  ;;  %v1136_v54 = vadd.f32 %v1128_v28, %v1084_v21 }
 0x119   : > { %v1137_v11 = vadd.f32 %v1129_v29, %v1085_v14  ;;  %v1138_v12 = vadd.f32 %v1130_v30, %v1086_v15  ;;  %v1146_v19 = vrot.slane %v2147_v63, %v2327_v57  ;;  %v1150_v55 = vrot.slane %v2149_v10, %v2327_v57 }
 0x11a   : > { %v1154_v31 = vrot.slane %v2151_v9, %v2327_v57  ;;  %v1158_v20 = vrot.slane %v2153_v49, %v2327_v57  ;;  %v1162_v56 = vrot.slane %v2155_v37, %v2327_v57  ;;  %v1166_v44 = vrot.slane %v2157_v38, %v2327_v57 }
 0x11b   : > { %v1170_v8 = vrot.slane %v2159_v40, %v2327_v57  ;;  %v1174_v45 = vrot.slane %v2161_v16, %v2327_v57  ;;  %v1175_v21 = vmul.f32 %v1146_v19, %v1141_v13  ;;  %v1176_v14 = vmul.f32 %v1150_v55, %v1141_v13 }
 0x11c   : > { %v1177_v15 = vmul.f32 %v1154_v31, %v1141_v13  ;;  %v1178_v18 = vmul.f32 %v1158_v20, %v1141_v13  ;;  %v1179_v35 = vmul.f32 %v1162_v56, %v1141_v13  ;;  %v1180_v59 = vmul.f32 %v1166_v44, %v1141_v13 }
 0x11d   : > { %v1181_v50 = vmul.f32 %v1170_v8, %v1141_v13  ;;  %v1182_v33 = vmul.f32 %v1174_v45, %v1141_v13  ;;  %v1183_v34 = vadd.f32 %v1175_v21, %v1131_v32  ;;  %v1184_v36 = vadd.f32 %v1176_v14, %v1132_v7 }
 0x11e   : > { %v1185_v42 = vadd.f32 %v1177_v15, %v1133_v22  ;;  %v1186_v52 = vadd.f32 %v1178_v18, %v1134_v60  ;;  %v1187_v1 = vadd.f32 %v1179_v35, %v1135_v0  ;;  %v1188_v24 = vadd.f32 %v1180_v59, %v1136_v54 }
 0x11f   : > { %v1189_v2 = vadd.f32 %v1181_v50, %v1137_v11  ;;  %v1190_v3 = vadd.f32 %v1182_v33, %v1138_v12  ;;  %v1235_v39 = vadd.f32 %v1227_v43, %v1183_v34  ;;  %v1236_v62 = vadd.f32 %v1228_v17, %v1184_v36 }
 0x120   : > { %v1237_v4 = vadd.f32 %v1229_v48, %v1185_v42  ;;  %v1238_v5 = vadd.f32 %v1230_v46, %v1186_v52  ;;  %v1239_v6 = vadd.f32 %v1231_v23, %v1187_v1  ;;  %v1240_v53 = vadd.f32 %v1232_v58, %v1188_v24 }
 0x121   : > { %v1241_v27 = vadd.f32 %v1233_v51, %v1189_v2  ;;  %v1242_v41 = vadd.f32 %v1234_v61, %v1190_v3  ;;  %v1250_v26 = vrot.slane %v2147_v63, %v1833_v47  ;;  %v1254_v28 = vrot.slane %v2149_v10, %v1833_v47 }
 0x122   : > { %v1258_v29 = vrot.slane %v2151_v9, %v1833_v47  ;;  %v1262_v43 = vrot.slane %v2153_v49, %v1833_v47  ;;  %v1266_v17 = vrot.slane %v2155_v37, %v1833_v47  ;;  %v1270_v48 = vrot.slane %v2157_v38, %v1833_v47 }
 0x123   : > { %v1274_v46 = vrot.slane %v2159_v40, %v1833_v47  ;;  %v1278_v63 = vrot.slane %v2161_v16, %v1833_v47  ;;  %v1279_v23 = vmul.f32 %v1250_v26, %v1245_v25  ;;  %v1280_v10 = vmul.f32 %v1254_v28, %v1245_v25 }
 0x124   : > { %v1281_v58 = vmul.f32 %v1258_v29, %v1245_v25  ;;  %v1282_v51 = vmul.f32 %v1262_v43, %v1245_v25  ;;  %v1283_v9 = vmul.f32 %v1266_v17, %v1245_v25  ;;  %v1284_v61 = vmul.f32 %v1270_v48, %v1245_v25 }
 0x125   : > { %v1285_v30 = vmul.f32 %v1274_v46, %v1245_v25  ;;  %v1286_v49 = vmul.f32 %v1278_v63, %v1245_v25  ;;  %v1287_v32 = vadd.f32 %v1279_v23, %v1235_v39  ;;  %v1288_v37 = vadd.f32 %v1280_v10, %v1236_v62 }
 0x126   : > { %v1289_v7 = vadd.f32 %v1281_v58, %v1237_v4  ;;  %v1290_v22 = vadd.f32 %v1282_v51, %v1238_v5  ;;  %v1291_v38 = vadd.f32 %v1283_v9, %v1239_v6  ;;  %v1292_v60 = vadd.f32 %v1284_v61, %v1240_v53 }
 0x127   : > { %v1293_v0 = vadd.f32 %v1285_v30, %v1241_v27  ;;  %v1294_v40 = vadd.f32 %v1286_v49, %v1242_v41  ;;  %v1295_v54 = vmax.f32 %v1287_v32, 0.0  ;;  %v1296_v11 = vmax.f32 %v1288_v37, 0.0 }
 0x128   : > { %v1297_v47 = vmax.f32 %v1289_v7, 0.0  ;;  %v1298_v16 = vmax.f32 %v1290_v22, 0.0  ;;  %v1299_v12 = vmax.f32 %v1291_v38, 0.0  ;;  %v1300_v13 = vmax.f32 %v1292_v60, 0.0 }
 0x129   : > { %v1301_v57 = vmax.f32 %v1293_v0, 0.0  ;;  %v1302_v19 = vmax.f32 %v1294_v40, 0.0  ;;  %v1311_v55 = vcombine.low %v1295_v54, %v1296_v11  ;;  %1330 = sbr.rel (!%p2328_p6) target bundleno = 328 (0x148), region = 56 }
 0x12a   : > { %v1312_v31 = vcombine.low %v1297_v47, %v1298_v16  ;;  %v1313_v20 = vcombine.low %v1299_v12, %v1300_v13 }
 0x12b   : > { %v1314_v56 = vcombine.low %v1301_v57, %v1302_v19  ;;  %1319 = vst [vmem:[%s300_s16] sm:$0x77] %v1311_v55 }
 0x12c   : > { %1320 = vst [vmem:[%s300_s16 + $0x8] sm:$0x77] %v1312_v31  ;;  %1321 = vst [vmem:[%s300_s16 + $0x10] sm:$0x77] %v1313_v20 }
 0x12d   : > { %1322 = vst [vmem:[%s300_s16 + $0x18] sm:$0x77] %v1314_v56 }
 0x12e   : > { %s2339_s8 = smov (!%p1333_p9, %s1332_s8), 8 }
 0x12f   : > { %s2248_s9 = sshll.u32 %s2339_s8, 6 }
 0x130   : > { %s1337_s11 = ssub.s32 512, %s2248_s9 }
 0x131   : > { %1338 = vsyncadd %s1324_s18, %s1337_s11  ;;  %p1430_p10 = scmp.ne.s32.totalorder %s2248_s9, 0  ;;  %s1437_s17 = sshll.u32 %s1669_s28, 9 }
 0x132   : > { %s1341_s21 = scalar_lea.hbm %s2300_s7, %s1437_s17  ;;  %s1344_s22 = sshll.u32 %s300_s16, 4  ;;  %s1345_s22 = int_to_ptr.vmem [resolvable:$true] %s1344_s22 }
 0x133   : > { %s1532_s23 = scalar_lea.vmem %s1345_s22, %s2248_s9  ;;  %s1607_s29 = smov [#allocation5]  }
 0x134   : > { %p1533_p11 = scmp.ne.s32.totalorder %s1345_s22, %s1532_s23  ;;  %s1536_s15 = sshll.u32 %s1607_s29, 4  ;;  %s1537_s15 = int_to_ptr.vmem [resolvable:$false] %s1536_s15 }
 0x135   : > { %s1538_s14 = scalar_lea.vmem %s1537_s15, 1024  ;;  %p1539_p7 = scmp.lt.s32.totalorder %s1345_s22, %s1537_s15 }
 0x136   : > { %p1534_p13 = pnand %p1533_p11, %p1430_p10  ;;  %p1540_p8 = scmp.lt.s32.totalorder %s1538_s14, %s1532_s23 }
 0x138   : > { %p1535_p5 = pneg %p1534_p13  ;;  %p1541_p12 = por %p1540_p8, %p1539_p7 }
 0x13a   : > { %p1542_p0 = pnand %p1541_p12, %p1535_p5 }
 0x13c   : > { %1545 = shalt.err (!%p1542_p0)
}
 0x13d   : > { %s1546_s28 = scalar_lea.hbm %s1341_s21, %s2248_s9  ;;  %s1550_s8 = scalar_lea.hbm %s2300_s7, 768 }
 0x13e   : > { %p1547_p1 = scmp.ne.s32.totalorder %s1341_s21, %s1546_s28  ;;  %p1551_p4 = scmp.lt.s32.totalorder %s1341_s21, %s2300_s7 }
 0x13f   : > { %p1552_p6 = scmp.lt.s32.totalorder %s1550_s8, %s1546_s28 }
 0x140   : > { %p1548_p2 = pnand %p1547_p1, %p1430_p10 }
 0x141   : > { %p1553_p9 = por %p1552_p6, %p1551_p4 }
 0x142   : > { %p1549_p3 = pneg %p1548_p2 }
 0x144   : > { %p1554_p11 = pnand %p1553_p9, %p1549_p3 }
 0x146   : > { %1557 = shalt.err (!%p1554_p11)
}
 0x147   : > { %1347 = dma.vmem_to_hbm [thread:$0]  (%p1430_p10), %s1345_s22, %s2248_s9, %s1341_s21, %s1324_s18  }
 0x148 PF: > { %s1356_s12 = sand.u32 1, %s1584_s24   ;;  %p2329_p13 = scmp.ne.s32.totalorder %s2309_s13, 0 }
 0x149   : > { %p2330_p5 = scmp.ge.s32.totalorder %s1596_s27, 2  ;;  %s1357_s19 = scalar_lea.sflag [#allocation4], %s1356_s12 }
 0x14b   : > { %p1441_p7 = pnand %p2330_p5, %p2329_p13 }
 0x14d   : > { %p1442_p8 = pneg %p1441_p7 }
 0x14f   : > { %1579 = dma.done.wait (%p1442_p8), %s1357_s19, 512  }
 0x150   : > { %1581 = vsyncadd (%p1442_p8), %s1357_s19, 4294966784  ;;  %s2331_s23 = sld [smem:[#allocation8_spill]]  ;;  %p20_p12 = scmp.ge.s32.totalorder %s1673_s30, 4  }
 0x151   : > { %s2332_s24 = smov %s1588_s25  ;;  %s2333_s25 = smov %s1592_s26 }
 0x152   : > { %s2335_s27 = smov %s1673_s30  ;;  %22 = sbr.rel (!%p20_p12) target bundleno = 5 (0x5), region = 93 }
 0x156   : > { %s2334_s26 = smov %s2331_s23 }
 0x157   :  { %1362 = vsyncpa [#allocation3], 1 }
 0x158   :  { %1364 = vsyncpa [#allocation3 + $0x1], 1 }
 0x159   :  { %1365 = vsyncpa [#allocation4], 1 }
 0x15a   :  { %1367 = vsyncpa [#allocation4 + $0x1], 1 }

</bundles_post_ra>
